<compile_context>
chip_gen: v6e
topology: v6e:2x2x1
jax: 0.10.0
libtpu: 0.0.40
codegen_flags: <defaults>
</compile_context>

<pallas_src>
import functools

import numpy as np
import jax
import jax.numpy as jnp
from jax.experimental import pallas as pl
from jax.experimental.pallas import tpu as pltpu

IN_DIM = 4
OUT_DIM = 4
HIDDEN = 32
NUM_LAYERS = 4
BATCH = 8


def _round_up(x, n):
    return ((x + n - 1) // n) * n


def _cdiv(a, b):
    return -(-a // b)


def _cores_per_device():
    """Dual-TensorCore detection (v4 / v5p megacore, v7x). Perf-only heuristic."""
    try:
        kind = jax.devices()[0].device_kind.lower()
    except Exception:
        return 1
    return 2 if any(tag in kind for tag in ("v7", "v5p", "v4")) else 1


def _choose_tiling(m, cores, max_tile=2048, min_tile_per_core=512):
    """Pick (tm, m_pad, steps).

    Few, large, 128-multiple batch tiles: a single step whenever the padded
    batch fits in max_tile lanes.  On dual-TC parts use an even step count
    (each piece >= min_tile_per_core lanes) so both TensorCores get equal work.
    """
    m128 = _round_up(max(m, 1), 128)
    if cores > 1 and m128 >= cores * min_tile_per_core:
        per_core = _cdiv(m128, cores)
        steps = cores * _cdiv(per_core, max_tile)
    else:
        steps = _cdiv(m128, max_tile)
    tm = _round_up(_cdiv(m128, steps), 128)
    return tm, tm * steps, steps


def fcnn_kernel(x_ref, w_ref, b_ref, y_ref, *, num_layers, out_pad):
    """One batch tile of the FCNN forward, feature-major / batch-on-lanes.

    x_ref: (H, TM)       zero-padded input tile (real features in first rows)
    w_ref: (L, H, H)     zero-padded weight slab; layer k stored as (out_k, in_k)
    b_ref: (L, H, 1)     zero-padded bias slab
    y_ref: (out_pad, TM) output tile (real outputs in the first rows)
    """
    h = x_ref[...]                                    # (H, TM), f32
    # hidden layers: tanh(W @ h + b); zero padding keeps padded rows/cols exact.
    for k in range(num_layers - 1):
        h = jnp.tanh(
            jnp.dot(w_ref[k], h, preferred_element_type=jnp.float32) + b_ref[k])
    # final linear layer: slice padded weight/bias rows BEFORE the dot so the
    # MXU only produces (out_pad, TM); slice at sublane row 8 is tile-aligned.
    w_last = w_ref[num_layers - 1, :out_pad, :]       # (out_pad, H)
    b_last = b_ref[num_layers - 1, :out_pad, :]       # (out_pad, 1)
    y_ref[...] = jnp.dot(w_last, h, preferred_element_type=jnp.float32) + b_last


def pack_fcnn_params(weights, biases):
    """Pack all layer weights/biases into two zero-padded slabs, ONCE at init."""
    num_layers = len(weights)
    in_dim = np.asarray(weights[0]).shape[1]
    out_dim = np.asarray(weights[-1]).shape[0]
    feat_max = max(max(np.asarray(w).shape[0] for w in weights),
                   max(np.asarray(w).shape[1] for w in weights))
    H = _round_up(feat_max, 8)
    w_slab = np.zeros((num_layers, H, H), np.float32)
    b_slab = np.zeros((num_layers, H, 1), np.float32)
    for k, (wk, bk) in enumerate(zip(weights, biases)):
        o, i = np.asarray(wk).shape
        w_slab[k, :o, :i] = np.asarray(wk, np.float32)
        b_slab[k, :o, 0] = np.asarray(bk, np.float32)
    meta = dict(num_layers=num_layers, in_dim=in_dim, out_dim=out_dim, H=H)
    return jnp.asarray(w_slab), jnp.asarray(b_slab), meta


def make_fcnn_forward(weights, biases, *, max_tile=2048):
    """Build a jitted FCNN.forward closed over the pre-packed parameter slabs."""
    w_slab, b_slab, meta = pack_fcnn_params(weights, biases)
    H = meta["H"]
    num_layers = meta["num_layers"]
    in_dim = meta["in_dim"]
    out_dim = meta["out_dim"]
    out_pad = _round_up(out_dim, 8)
    cores = _cores_per_device()
    kernel = functools.partial(fcnn_kernel, num_layers=num_layers,
                               out_pad=out_pad)

    @jax.jit
    def forward(x):
        m = x.shape[0]
        tm, m_pad, steps = _choose_tiling(m, cores, max_tile)
        # Lane-dense layout: batch on lanes, features on sublanes, zero-padded.
        x_t = jnp.zeros((H, m_pad), jnp.float32).at[:in_dim, :m].set(
            x.astype(jnp.float32).T)
        y_t = pl.pallas_call(
            kernel,
            out_shape=jax.ShapeDtypeStruct((out_pad, m_pad), jnp.float32),
            grid=(steps,),
            in_specs=[
                pl.BlockSpec((H, tm), lambda i: (0, i)),                 # x tile
                pl.BlockSpec((num_layers, H, H), lambda i: (0, 0, 0)),   # weights (resident)
                pl.BlockSpec((num_layers, H, 1), lambda i: (0, 0, 0)),   # biases  (resident)
            ],
            out_specs=pl.BlockSpec((out_pad, tm), lambda i: (0, i)),
            compiler_params=pltpu.CompilerParams(
                dimension_semantics=("parallel",)),
        )(x_t, w_slab, b_slab)
        return y_t[:out_dim, :m].T

    return forward


def reference_forward(x, weights, biases):
    """Pure-JAX reference matching the PyTorch FCNN forward."""
    h = x.astype(jnp.float32)
    for k in range(len(weights) - 1):
        h = jnp.tanh(h @ weights[k].T + biases[k])
    return h @ weights[-1].T + biases[-1]


if __name__ == "__main__":
    key = jax.random.PRNGKey(0)
    keys = jax.random.split(key, 2 * NUM_LAYERS + 2)

    layer_dims = ([(HIDDEN, IN_DIM)]
                  + [(HIDDEN, HIDDEN)] * (NUM_LAYERS - 2)
                  + [(OUT_DIM, HIDDEN)])
    weights = [0.3 * jax.random.normal(keys[k], d, jnp.float32)
               for k, d in enumerate(layer_dims)]
    biases = [0.1 * jax.random.normal(keys[NUM_LAYERS + k], (d[0],), jnp.float32)
              for k, d in enumerate(layer_dims)]

    # Parameters are packed once here; per-call path only pads/transposes x.
    fcnn = make_fcnn_forward(weights, biases)

    # Small batch -> one 128-lane tile, single grid step.
    x_small = jax.random.normal(keys[-2], (BATCH, IN_DIM), jnp.float32)
    y_small = jax.block_until_ready(fcnn(x_small))
    np.testing.assert_allclose(
        np.asarray(y_small),
        np.asarray(reference_forward(x_small, weights, biases)),
        atol=1e-5, rtol=1e-5)

    # Larger ragged batch: padded to 384 lanes -> a single big tile (whole
    # batch in one grid step) instead of 3 small 128-lane steps.
    x_big = jax.random.normal(keys[-1], (300, IN_DIM), jnp.float32)
    y_big = jax.block_until_ready(fcnn(x_big))
    np.testing.assert_allclose(
        np.asarray(y_big),
        np.asarray(reference_forward(x_big, weights, biases)),
        atol=1e-5, rtol=1e-5)

    print("KERNEL_OK")
</pallas_src>

<mosaic_0001>
module attributes {stable_mosaic.version = 11 : i64} {
  func.func @fcnn_kernel(%arg0: i32, %arg1: memref<32x128xf32, #tpu.memory_space<vmem>>, %arg2: memref<4x32x32xf32, #tpu.memory_space<vmem>>, %arg3: memref<4x32x1xf32, #tpu.memory_space<vmem>>, %arg4: memref<8x128xf32, #tpu.memory_space<vmem>>) attributes {dimension_semantics = [#tpu.dimension_semantics<parallel>], iteration_bounds = array<i64: 1>, scalar_prefetch = 0 : i64, scratch_operands = 0 : i64, tpu.core_type = #tpu.core_type<tc>, window_params = [{transform_indices = @transform_0, window_bounds = array<i64: 32, 128>}, {pipeline_mode = #tpu.pipeline_mode<synchronous>, transform_indices = @transform_1, window_bounds = array<i64: 4, 32, 32>}, {pipeline_mode = #tpu.pipeline_mode<synchronous>, transform_indices = @transform_2, window_bounds = array<i64: 4, 32, 1>}, {transform_indices = @transform_3, window_bounds = array<i64: 8, 128>}]} {
    %c0 = arith.constant 0 : index
    %c0_0 = arith.constant 0 : index
    %0 = vector.load %arg1[%c0, %c0_0] : memref<32x128xf32, #tpu.memory_space<vmem>>, vector<32x128xf32>
    %c0_1 = arith.constant 0 : index
    %c0_2 = arith.constant 0 : index
    %c0_3 = arith.constant 0 : index
    %1 = vector.load %arg2[%c0_1, %c0_2, %c0_3] : memref<4x32x32xf32, #tpu.memory_space<vmem>>, vector<1x32x32xf32>
    %2 = vector.shape_cast %1 : vector<1x32x32xf32> to vector<32x32xf32>
    %cst = arith.constant dense<0.000000e+00> : vector<32x128xf32>
    %3 = tpu.matmul %2, %0, %cst {dimension_numbers = #tpu.dot_dimension_numbers<[1], [0], [0], [1], [0, 0, 1, 1], [], []>} : vector<32x32xf32>, vector<32x128xf32>, vector<32x128xf32> -> vector<32x128xf32>
    %c0_4 = arith.constant 0 : index
    %c0_5 = arith.constant 0 : index
    %c0_6 = arith.constant 0 : index
    %4 = vector.load %arg3[%c0_4, %c0_5, %c0_6] : memref<4x32x1xf32, #tpu.memory_space<vmem>>, vector<1x32x1xf32>
    %5 = vector.shape_cast %4 : vector<1x32x1xf32> to vector<32x1xf32>
    %6 = vector.broadcast %5 : vector<32x1xf32> to vector<32x128xf32>
    %7 = arith.addf %3, %6 : vector<32x128xf32>
    %8 = math.tanh %7 : vector<32x128xf32>
    %c1 = arith.constant 1 : index
    %c0_7 = arith.constant 0 : index
    %c0_8 = arith.constant 0 : index
    %9 = vector.load %arg2[%c1, %c0_7, %c0_8] : memref<4x32x32xf32, #tpu.memory_space<vmem>>, vector<1x32x32xf32>
    %10 = vector.shape_cast %9 : vector<1x32x32xf32> to vector<32x32xf32>
    %cst_9 = arith.constant dense<0.000000e+00> : vector<32x128xf32>
    %11 = tpu.matmul %10, %8, %cst_9 {dimension_numbers = #tpu.dot_dimension_numbers<[1], [0], [0], [1], [0, 0, 1, 1], [], []>} : vector<32x32xf32>, vector<32x128xf32>, vector<32x128xf32> -> vector<32x128xf32>
    %c1_10 = arith.constant 1 : index
    %c0_11 = arith.constant 0 : index
    %c0_12 = arith.constant 0 : index
    %12 = vector.load %arg3[%c1_10, %c0_11, %c0_12] : memref<4x32x1xf32, #tpu.memory_space<vmem>>, vector<1x32x1xf32>
    %13 = vector.shape_cast %12 : vector<1x32x1xf32> to vector<32x1xf32>
    %14 = vector.broadcast %13 : vector<32x1xf32> to vector<32x128xf32>
    %15 = arith.addf %11, %14 : vector<32x128xf32>
    %16 = math.tanh %15 : vector<32x128xf32>
    %c2 = arith.constant 2 : index
    %c0_13 = arith.constant 0 : index
    %c0_14 = arith.constant 0 : index
    %17 = vector.load %arg2[%c2, %c0_13, %c0_14] : memref<4x32x32xf32, #tpu.memory_space<vmem>>, vector<1x32x32xf32>
    %18 = vector.shape_cast %17 : vector<1x32x32xf32> to vector<32x32xf32>
    %cst_15 = arith.constant dense<0.000000e+00> : vector<32x128xf32>
    %19 = tpu.matmul %18, %16, %cst_15 {dimension_numbers = #tpu.dot_dimension_numbers<[1], [0], [0], [1], [0, 0, 1, 1], [], []>} : vector<32x32xf32>, vector<32x128xf32>, vector<32x128xf32> -> vector<32x128xf32>
    %c2_16 = arith.constant 2 : index
    %c0_17 = arith.constant 0 : index
    %c0_18 = arith.constant 0 : index
    %20 = vector.load %arg3[%c2_16, %c0_17, %c0_18] : memref<4x32x1xf32, #tpu.memory_space<vmem>>, vector<1x32x1xf32>
    %21 = vector.shape_cast %20 : vector<1x32x1xf32> to vector<32x1xf32>
    %22 = vector.broadcast %21 : vector<32x1xf32> to vector<32x128xf32>
    %23 = arith.addf %19, %22 : vector<32x128xf32>
    %24 = math.tanh %23 : vector<32x128xf32>
    %c3 = arith.constant 3 : index
    %c0_19 = arith.constant 0 : index
    %c0_20 = arith.constant 0 : index
    %25 = vector.load %arg2[%c3, %c0_19, %c0_20] : memref<4x32x32xf32, #tpu.memory_space<vmem>>, vector<1x8x32xf32>
    %26 = vector.shape_cast %25 : vector<1x8x32xf32> to vector<8x32xf32>
    %c3_21 = arith.constant 3 : index
    %c0_22 = arith.constant 0 : index
    %c0_23 = arith.constant 0 : index
    %27 = vector.load %arg3[%c3_21, %c0_22, %c0_23] : memref<4x32x1xf32, #tpu.memory_space<vmem>>, vector<1x8x1xf32>
    %28 = vector.shape_cast %27 : vector<1x8x1xf32> to vector<8x1xf32>
    %cst_24 = arith.constant dense<0.000000e+00> : vector<8x128xf32>
    %29 = tpu.matmul %26, %24, %cst_24 {dimension_numbers = #tpu.dot_dimension_numbers<[1], [0], [0], [1], [0, 0, 1, 1], [], []>} : vector<8x32xf32>, vector<32x128xf32>, vector<8x128xf32> -> vector<8x128xf32>
    %30 = vector.broadcast %28 : vector<8x1xf32> to vector<8x128xf32>
    %31 = arith.addf %29, %30 : vector<8x128xf32>
    %c0_25 = arith.constant 0 : index
    %c0_26 = arith.constant 0 : index
    %32 = vector.load %arg4[%c0_25, %c0_26] : memref<8x128xf32, #tpu.memory_space<vmem>>, vector<8x128xf32>
    tpu.vector_store %arg4[%c0_25, %c0_26], %31 {strides = array<i32>} : memref<8x128xf32, #tpu.memory_space<vmem>>, vector<8x128xf32>,
    return
  }
  func.func @transform_0(%arg0: i32) -> (i32, i32) {
    %c0_i32 = arith.constant 0 : i32
    %c0_i32_0 = arith.constant 0 : i32
    return %c0_i32, %arg0 : i32, i32
  }
  func.func @transform_1(%arg0: i32) -> (i32, i32, i32) {
    %c0_i32 = arith.constant 0 : i32
    %c0_i32_0 = arith.constant 0 : i32
    %c0_i32_1 = arith.constant 0 : i32
    %c0_i32_2 = arith.constant 0 : i32
    return %c0_i32, %c0_i32_0, %c0_i32_1 : i32, i32, i32
  }
  func.func @transform_2(%arg0: i32) -> (i32, i32, i32) {
    %c0_i32 = arith.constant 0 : i32
    %c0_i32_0 = arith.constant 0 : i32
    %c0_i32_1 = arith.constant 0 : i32
    %c0_i32_2 = arith.constant 0 : i32
    return %c0_i32, %c0_i32_0, %c0_i32_1 : i32, i32, i32
  }
  func.func @transform_3(%arg0: i32) -> (i32, i32) {
    %c0_i32 = arith.constant 0 : i32
    %c0_i32_0 = arith.constant 0 : i32
    return %c0_i32, %arg0 : i32, i32
  }
}

</mosaic_0001>

<bundles_post_ra>
// kernel: forward.1
= control target key start
LH: loop header
LB: loop body
LE: loop exit
PB: predicated region body
PF: predicated region fallthrough
CT: control target
= control target key end

     0   :  { %8 = vsyncpa [#allocation3], 0  ;;  %s760_s0 = inlined_call_operand.vmem [shape: f32[32,128], index: 0, kind: input, shape index: {}]   ;;  %s761_s1 = inlined_call_operand.hbm [shape: f32[4,32,32], index: 1, kind: input, shape index: {}]   ;;  %s762_s2 = inlined_call_operand.hbm [shape: f32[4,32,1], index: 2, kind: input, shape index: {}]   ;;  %s763_s3 = inlined_call_operand.vmem [shape: f32[8,128], index: 3, kind: output, shape index: {}]  }
   0x1   :  { %9 = vsyncpa [#allocation5], 0  ;;  %s699_s12 = smov [#allocation2]  }
   0x2   :  { %s17_s13 = sshll.u32 %s699_s12, 4  ;;  %s18_s13 = int_to_ptr.vmem [resolvable:$true] %s17_s13 }
   0x3   :  { %s663_s14 = scalar_lea.vmem %s18_s13, 2048  ;;  %p668_p1 = scmp.lt.s32.totalorder %s18_s13, %s18_s13 }
   0x4   :  { %p664_p0 = scmp.ne.s32.totalorder %s18_s13, %s663_s14  ;;  %p669_p2 = scmp.lt.s32.totalorder %s663_s14, %s663_s14 }
   0x6   :  { %p670_p3 = por %p669_p2, %p668_p1 }
   0x8   :  { %p671_p4 = pnand %p670_p3, %p664_p0 }
   0xa   :  { %674 = shalt.err (!%p671_p4)
}
   0xb   :  { %s700_s15 = smov 128   ;;  %s701_s16 = smov 8  }
   0xc   :  { %23 = dma.hbm_to_vmem [thread:$0]  %s761_s1, 2048, %s18_s13, [#allocation3], %s700_s15, %s700_s15, %s701_s16  }
   0xd   :  { %s702_s19 = smov [#allocation4]  }
   0xe   :  { %s29_s20 = sshll.u32 %s702_s19, 4  ;;  %s30_s20 = int_to_ptr.vmem [resolvable:$true] %s29_s20 }
   0xf   :  { %s683_s21 = scalar_lea.vmem %s30_s20, 2048  ;;  %p688_p6 = scmp.lt.s32.totalorder %s30_s20, %s30_s20 }
  0x10   :  { %p684_p5 = scmp.ne.s32.totalorder %s30_s20, %s683_s21  ;;  %p689_p7 = scmp.lt.s32.totalorder %s683_s21, %s683_s21 }
  0x12   :  { %p690_p8 = por %p689_p7, %p688_p6 }
  0x14   :  { %p691_p9 = pnand %p690_p8, %p684_p5 }
  0x16   :  { %694 = shalt.err (!%p691_p9)
}
  0x17   :  { %35 = dma.hbm_to_vmem [thread:$0]  %s762_s2, 2048, %s30_s20, [#allocation5], %s700_s15, %s700_s15, %s701_s16  }
  0x18   :  { %695 = dma.done.wait [#allocation3], 2048  }
  0x19   :  { %696 = vsyncadd [#allocation3], 4294965248 }
  0x1a   :  { %697 = dma.done.wait [#allocation5], 2048  }
  0x1b   :  { %698 = vsyncadd [#allocation5], 4294965248  ;;  %v703_v0 = vmov 0   ;;  %vm74_vm0 = vcmask 261120   ;;  %v45_v1 = vld [vmem:[%s760_s0 + $0x18] sm:$0xff]  ;;  %v44_v2 = vld [vmem:[%s760_s0 + $0x10] sm:$0xff] }
  0x1c   :  { %629 = vset.pattern.permute.xlu0 %v703_v0  ;;  %630 = vset.pattern.permute.xlu1 %v703_v0  ;;  %v46_v3 = vld [vmem:[#allocation2] sm:$0xff]  ;;  %v43_v4 = vld [vmem:[%s760_s0 + $0x8] sm:$0xff]  ;;  %v53_v5 = vld [vmem:[#allocation4 + $0x18] sm:$0xff]  ;;  %v704_v62 = vmov 0.0   ;;  %vm705_vm1 = vmmov 0  }
  0x1d   :  { %569 = vmatprep.subr.mxu0 %v45_v1  ;;  %577 = vmatprep.mubr.msk.f32.mxu0 %vm74_vm0, %v46_v3  ;;  %v51_v6 = vld [vmem:[#allocation4 + $0x8] sm:$0xff]  ;;  %v42_v7 = vld [vmem:[%s760_s0] sm:$0xff]  ;;  %v52_v8 = vld [vmem:[#allocation4 + $0x10] sm:$0xff] }
  0x1e   :  { %570 = vmatpush3.msra.mxu0 %v45_v1  ;;  %71 = vperm.xlu0 %629, %v53_v5   ;;  %v50_v9 = vld [vmem:[#allocation4] sm:$0xff]  ;;  %v47_v10 = vld [vmem:[#allocation2 + $0x8] sm:$0xff]  ;;  %v48_v11 = vld [vmem:[#allocation2 + $0x10] sm:$0xff] }
  0x1f   :  { %571 = vmatprep.subr.mxu0 %v44_v2  ;;  %61 = vperm.xlu1 %630, %v51_v6   ;;  %v185_v12 = vld [vmem:[#allocation4 + $0x38] sm:$0xff]  ;;  %v184_v13 = vld [vmem:[#allocation4 + $0x30] sm:$0xff]  ;;  %v183_v15 = vld [vmem:[#allocation4 + $0x28] sm:$0xff] }
  0x20   :  { %572 = vmatpush3.msra.mxu0 %v44_v2  ;;  %v49_v14 = vld [vmem:[#allocation2 + $0x18] sm:$0xff]  ;;  %v182_v16 = vld [vmem:[#allocation4 + $0x20] sm:$0xff]  ;;  %v315_v18 = vld [vmem:[#allocation4 + $0x50] sm:$0xff] }
  0x21   :  { %573 = vmatprep.subr.mxu0 %v43_v4  ;;  %v316_v17 = vld [vmem:[#allocation4 + $0x58] sm:$0xff]  ;;  %v314_v19 = vld [vmem:[#allocation4 + $0x48] sm:$0xff]  ;;  %v313_v20 = vld [vmem:[#allocation4 + $0x40] sm:$0xff] }
  0x22   :  { %574 = vmatpush3.msra.mxu0 %v43_v4  ;;  %66 = vperm.xlu0 %629, %v52_v8   ;;  %v441_v21 = vld [vmem:[#allocation4 + $0x60] sm:$0xff]  ;;  %v178_v39 = vld [vmem:[#allocation2 + $0x28] sm:$0xff]  ;;  %v179_v40 = vld [vmem:[#allocation2 + $0x30] sm:$0xff] }
  0x23   :  { %575 = vmatprep.subr.mxu0 %v42_v7  ;;  %56 = vperm.xlu1 %630, %v50_v9   ;;  %v177_v22 = vld [vmem:[#allocation2 + $0x20] sm:$0xff]  ;;  %v180_v41 = vld [vmem:[#allocation2 + $0x38] sm:$0xff]  ;;  %v309_v59 = vld [vmem:[#allocation2 + $0x48] sm:$0xff] }
  0x24   :  { %576 = vmatpush3.msra.mxu0 %v42_v7  ;;  %591 = vmatprep.mubr.msk.f32.mxu1 %vm74_vm0, %v177_v22  ;;  %v308_v42 = vld [vmem:[#allocation2 + $0x40] sm:$0xff]  ;;  %v310_v60 = vld [vmem:[#allocation2 + $0x50] sm:$0xff]  ;;  %v311_v61 = vld [vmem:[#allocation2 + $0x58] sm:$0xff] }
  0x25   :  { %578 = vmatmul.mubr.msk.f32.vlgmr.msra.gmra.mxu0 %vm74_vm0, %v47_v10 }
  0x26   :  { %580 = vmatprep.mubr.msk.f32.mxu0 %vm74_vm0, %v48_v11  ;;  %203 = vperm.xlu0 %629, %v185_v12  }
  0x27   :  { %198 = vperm.xlu1 %630, %v184_v13  }
  0x29   :  { %581 = vmatmul.mubr.msk.f32.gmra.mxu0 %vm74_vm0, %v49_v14  ;;  %v439_v14 = vld [vmem:[#allocation2 + $0x60] sm:$0xff] }
  0x2a   :  { %193 = vperm.xlu0 %629, %v183_v15   ;;  %605 = vmatprep.mubr.msk.f32.mxu0 %vm74_vm0, %v308_v42 }
  0x2b   :  { %188 = vperm.xlu1 %630, %v182_v16  }
  0x2e   :  { %334 = vperm.xlu0 %629, %v316_v17  }
  0x2f   :  { %329 = vperm.xlu1 %630, %v315_v18  }
  0x32   :  { %324 = vperm.xlu0 %629, %v314_v19  }
  0x33   :  { %319 = vperm.xlu1 %630, %v313_v20  }
  0x36   :  { %444 = vperm.xlu0 %629, %v441_v21  }
  0x99   :  { %v72_v23 = vpop.permute.xlu0 %71 }
  0x9a   :  { %v62_v25 = vpop.permute.xlu1 %61 }
  0x9d   :  { %v67_v29 = vpop.permute.xlu0 %66 }
  0x9e   :  { %v57_v33 = vpop.permute.xlu1 %56 }
  0xa1   :  { %v204_v43 = vpop.permute.xlu0 %203 }
  0xa2   :  { %v199_v45 = vpop.permute.xlu1 %198 }
  0xa5   :  { %v194_v49 = vpop.permute.xlu0 %193 }
  0xa6   :  { %v189_v53 = vpop.permute.xlu1 %188 }
  0xa9   :  { %v335_v63 = vpop.permute.xlu0 %334 }
  0xaa   :  { %v330_v1 = vpop.permute.xlu1 %329 }
  0xad   :  { %v325_v5 = vpop.permute.xlu0 %324 }
  0xae   :  { %v320_v9 = vpop.permute.xlu1 %319 }
  0xb1   :  { %v445_v16 = vpop.permute.xlu0 %444 }
  0xe5   :  { %v579_v24 = vpop.f32.mrf.mxu0 }
  0xe6   :  { %v159_v31 = vadd.f32 %v579_v24, %v62_v25 }
  0xe7   :  { %v153_v26 = vpop.f32.mrf.mxu0 }
  0xe8   :  { %v154_v34 = vadd.f32 %v153_v26, %v57_v33 }
  0xe9   :  { %v582_v27 = vpop.f32.mrf.mxu0 }
  0xea   :  { %v169_v28 = vadd.f32 %v582_v27, %v72_v23 }
  0xeb   :  { %v163_v30 = vpop.f32.mrf.mxu0 }
  0xec   :  { %631 = vtanh.f32 %v169_v28  ;;  %v164_v32 = vadd.f32 %v163_v30, %v67_v29 }
  0xee   :  { %633 = vtanh.f32 %v164_v32 }
  0xef   :  { %635 = vtanh.f32 %v159_v31 }
  0xf0   :  { %637 = vtanh.f32 %v154_v34 }
  0xf9   :  { %v632_v35 = vpop.eup %631 }
  0xfa   :  { %583 = vmatprep.subr.mxu1 %v632_v35 }
  0xfb   :  { %v634_v36 = vpop.eup %633  ;;  %584 = vmatpush3.msra.mxu1 %v632_v35 }
  0xfc   :  { %585 = vmatprep.subr.mxu1 %v634_v36  ;;  %v636_v37 = vpop.eup %635 }
  0xfd   :  { %586 = vmatpush3.msra.mxu1 %v634_v36  ;;  %v638_v38 = vpop.eup %637 }
  0xfe   :  { %587 = vmatprep.subr.mxu1 %v636_v37 }
  0xff   :  { %588 = vmatpush3.msra.mxu1 %v636_v37 }
 0x100   :  { %589 = vmatprep.subr.mxu1 %v638_v38 }
 0x101   :  { %590 = vmatpush3.msra.mxu1 %v638_v38 }
 0x102   :  { %592 = vmatmul.mubr.msk.f32.vlgmr.msra.gmra.mxu1 %vm74_vm0, %v178_v39  ;;  %611 = vmatprep.subr.mxu1 %v704_v62 }
 0x103   :  { %594 = vmatprep.mubr.msk.f32.mxu1 %vm74_vm0, %v179_v40 }
 0x106   :  { %595 = vmatmul.mubr.msk.f32.gmra.mxu1 %vm74_vm0, %v180_v41 }
 0x107   :  { %619 = vmatprep.mubr.msk.f32.mxu1 %vm705_vm1, %v704_v62 }
 0x1c2   :  { %v593_v44 = vpop.f32.mrf.mxu1 }
 0x1c3   :  { %v290_v51 = vadd.f32 %v593_v44, %v194_v49 }
 0x1c4   :  { %v284_v46 = vpop.f32.mrf.mxu1 }
 0x1c5   :  { %v285_v54 = vadd.f32 %v284_v46, %v189_v53 }
 0x1c6   :  { %v596_v47 = vpop.f32.mrf.mxu1 }
 0x1c7   :  { %v300_v48 = vadd.f32 %v596_v47, %v204_v43 }
 0x1c8   :  { %v294_v50 = vpop.f32.mrf.mxu1 }
 0x1c9   :  { %639 = vtanh.f32 %v300_v48  ;;  %v295_v52 = vadd.f32 %v294_v50, %v199_v45 }
 0x1cb   :  { %641 = vtanh.f32 %v295_v52 }
 0x1cc   :  { %643 = vtanh.f32 %v290_v51 }
 0x1cd   :  { %645 = vtanh.f32 %v285_v54 }
 0x1d6   :  { %v640_v55 = vpop.eup %639 }
 0x1d7   :  { %597 = vmatprep.subr.mxu0 %v640_v55 }
 0x1d8   :  { %v642_v56 = vpop.eup %641  ;;  %598 = vmatpush3.msra.mxu0 %v640_v55 }
 0x1d9   :  { %599 = vmatprep.subr.mxu0 %v642_v56  ;;  %v644_v57 = vpop.eup %643 }
 0x1da   :  { %600 = vmatpush3.msra.mxu0 %v642_v56  ;;  %v646_v58 = vpop.eup %645 }
 0x1db   :  { %601 = vmatprep.subr.mxu0 %v644_v57 }
 0x1dc   :  { %602 = vmatpush3.msra.mxu0 %v644_v57 }
 0x1dd   :  { %603 = vmatprep.subr.mxu0 %v646_v58 }
 0x1de   :  { %604 = vmatpush3.msra.mxu0 %v646_v58 }
 0x1df   :  { %606 = vmatmul.mubr.msk.f32.vlgmr.msra.gmra.mxu0 %vm74_vm0, %v309_v59 }
 0x1e0   :  { %608 = vmatprep.mubr.msk.f32.mxu0 %vm74_vm0, %v310_v60 }
 0x1e3   :  { %609 = vmatmul.mubr.msk.f32.gmra.mxu0 %vm74_vm0, %v311_v61 }
 0x29f   :  { %v607_v0 = vpop.f32.mrf.mxu0 }
 0x2a0   :  { %v421_v7 = vadd.f32 %v607_v0, %v325_v5 }
 0x2a1   :  { %v415_v2 = vpop.f32.mrf.mxu0 }
 0x2a2   :  { %v416_v10 = vadd.f32 %v415_v2, %v320_v9 }
 0x2a3   :  { %v610_v3 = vpop.f32.mrf.mxu0 }
 0x2a4   :  { %v431_v4 = vadd.f32 %v610_v3, %v335_v63 }
 0x2a5   :  { %v425_v6 = vpop.f32.mrf.mxu0 }
 0x2a6   :  { %647 = vtanh.f32 %v431_v4  ;;  %v426_v8 = vadd.f32 %v425_v6, %v330_v1 }
 0x2a8   :  { %649 = vtanh.f32 %v426_v8 }
 0x2a9   :  { %651 = vtanh.f32 %v421_v7 }
 0x2aa   :  { %653 = vtanh.f32 %v416_v10 }
 0x2b3   :  { %v648_v11 = vpop.eup %647 }
 0x2b4   :  { %612 = vmatpush3.msra.mxu1 %v648_v11 }
 0x2b5   :  { %v650_v12 = vpop.eup %649  ;;  %613 = vmatprep.subr.mxu1 %v704_v62 }
 0x2b6   :  { %614 = vmatpush3.msra.mxu1 %v650_v12  ;;  %v652_v13 = vpop.eup %651 }
 0x2b7   :  { %615 = vmatprep.subr.mxu1 %v704_v62  ;;  %v654_v15 = vpop.eup %653 }
 0x2b8   :  { %616 = vmatpush3.msra.mxu1 %v652_v13 }
 0x2b9   :  { %617 = vmatprep.subr.mxu1 %v704_v62 }
 0x2ba   :  { %618 = vmatpush3.msra.mxu1 %v654_v15 }
 0x2bb   :  { %620 = vmatmul.mubr.msk.f32.vlgmr.msra.gmra.mxu1 %vm74_vm0, %v439_v14 }
 0x37b   :  { %v516_v17 = vpop.f32.mrf.mxu1 }
 0x37c   :  { %v517_v18 = vadd.f32 %v516_v17, %v445_v16 }
 0x37d   :  { %v621_v19 = vpop.f32.mrf.mxu1 }
 0x37e   :  { %520 = vst [vmem:[%s763_s3] sm:$0xff] %v517_v18 }
 0x37f   :  { %525 = vsyncpa [#allocation3], 1 }
 0x380   :  { %526 = vsyncpa [#allocation5], 1 }

</bundles_post_ra>
